<compile_context>
chip_gen: v7x
topology: tpu7x:2x2x1
jax: 0.10.0
libtpu: 0.0.40
codegen_flags: <defaults>
</compile_context>

<pallas_src>
import functools

import jax
import jax.numpy as jnp
from jax import lax
from jax.experimental import pallas as pl
from jax.experimental.pallas import tpu as pltpu


def _round_up(x, m):
    return (x + m - 1) // m * m


def _shift_flat(x2d, off, hw):
    """result[:, p] = x2d[:, p + off] for 0 <= p + off < hw, else 0.

    Static lane slices + concat; Mosaic lowers this to XLU lane rotates (same
    hardware path as pltpu.roll), so it does not consume VPU slots.
    """
    if off == 0:
        return x2d
    rows = x2d.shape[0]
    zpad = jnp.zeros((rows, abs(off)), x2d.dtype)
    if off > 0:
        return jnp.concatenate([x2d[:, off:], zpad], axis=1)
    return jnp.concatenate([zpad, x2d[:, : hw + off]], axis=1)


def _stacked_conv_kernel(*refs, H, W):
    """Fused StackedConvLayers body: all blocks in one kernel invocation.

    refs = (x_ref, w0_ref, shift0_ref, w1_ref, shift1_ref, ..., out_ref)
      x_ref:       (1, Cin_p, H*W)    bf16  channel-padded, spatially flat
      w{b}_ref:    (Cout_p, 9*Cin_p)  bf16  im2col weights, BN scale folded in
      shift{b}_ref:(Cout_p, 1)        f32   fused conv-bias + BN shift
      out_ref:     (1, Cout_p, H*W)
    """
    x_ref = refs[0]
    out_ref = refs[-1]
    param_refs = refs[1:-1]
    n_blocks = len(param_refs) // 2
    HW = H * W

    # Column-boundary masks, shared by every fused block (2 masks total).
    # Vertical (top/bottom row) boundaries are handled for free by the zero
    # fill of the +-W lane shifts below.
    px = lax.broadcasted_iota(jnp.int32, (1, HW), 1) % W
    mask_l = px >= 1          # valid destinations for the dw = -1 taps
    mask_r = px < (W - 1)     # valid destinations for the dw = +1 taps

    x2d = x_ref[0]                                     # (Cin_p, HW) bf16
    for b in range(n_blocks):
        w_ref = param_refs[2 * b]
        shift_ref = param_refs[2 * b + 1]

        # Three pre-masked horizontal variants; all 9 taps are +-W lane
        # shifts of these (2 selects per block instead of 8).
        zeros = jnp.zeros_like(x2d)
        h_m = jnp.where(mask_l, _shift_flat(x2d, -1, HW), zeros)   # dw = -1
        h_p = jnp.where(mask_r, _shift_flat(x2d, +1, HW), zeros)   # dw = +1

        taps = []
        for dh in (-1, 0, 1):                    # kernel row  kh = dh + 1
            for v in (h_m, x2d, h_p):            # kernel col  kw = dw + 1
                taps.append(_shift_flat(v, dh * W, HW))
        im2col = jnp.concatenate(taps, axis=0)   # (9*Cin_p, HW) bf16

        # One bf16 MXU matmul with f32 accumulation: (Cout_p, K) @ (K, HW).
        acc = jnp.dot(w_ref[...], im2col, preferred_element_type=jnp.float32)

        # Fused conv-bias + BN shift, then LeakyReLU(0.01).
        y = acc + shift_ref[...]                 # (Cout_p, HW) f32
        y = jnp.maximum(y, 0.01 * y)

        if b == n_blocks - 1:
            out_ref[...] = y[None].astype(out_ref.dtype)
        else:
            x2d = y.astype(jnp.bfloat16)         # stays in VMEM, no HBM trip


def stacked_conv_fused(x_flat, block_params, H, W, out_dtype):
    """All ConvDropoutNormNonlin blocks (inference) in one pallas_call."""
    N, cin_p, HW = x_flat.shape
    cout_p_last = block_params[-1][0].shape[0]

    in_specs = [pl.BlockSpec((1, cin_p, HW), lambda n: (n, 0, 0))]
    args = [x_flat]
    for w2d, shift in block_params:
        cout_p, k9 = w2d.shape
        # Weights / shifts are small and grid-invariant -> resident in VMEM.
        in_specs.append(pl.BlockSpec((cout_p, k9), lambda n: (0, 0)))
        in_specs.append(pl.BlockSpec((cout_p, 1), lambda n: (0, 0)))
        args += [w2d, shift]

    kernel = functools.partial(_stacked_conv_kernel, H=H, W=W)
    return pl.pallas_call(
        kernel,
        out_shape=jax.ShapeDtypeStruct((N, cout_p_last, HW), out_dtype),
        grid=(N,),
        in_specs=in_specs,
        out_specs=pl.BlockSpec((1, cout_p_last, HW), lambda n: (n, 0, 0)),
        compiler_params=pltpu.CompilerParams(
            dimension_semantics=("parallel",),
            # Blocks here are tiny; re-derive this against the 9x im2col
            # amplification (and v7x's 64 MiB VMEM) once row tiling is added.
            vmem_limit_bytes=32 * 1024 * 1024,
        ),
    )(*args)


def _prep_block_params(p, cin, eps=1e-5):
    """im2col weight matrix with BN scale folded in (f32) + fused shift."""
    w = p["w"]                                   # (3, 3, Cin, Cout) HWIO
    cout = w.shape[-1]
    # bf16 packs 16 sublanes per vreg -> pad channels to multiples of 16.
    cin_p = _round_up(cin, 16)
    cout_p = _round_up(cout, 16)

    inv_std = 1.0 / jnp.sqrt(p["running_var"] + eps)
    scale = p["gamma"] * inv_std                               # (Cout,)
    shift = (p["bias"] - p["running_mean"]) * scale + p["beta"]

    # Fold the BN scale into the weights in f32, THEN quantize to bf16.
    # (Cout, 3, 3, Cin) -> pad channels -> (Cout_p, 9*Cin_p); K order matches
    # the kernel's tap stacking: index = ((dh+1)*3 + (dw+1))*Cin_p + c.
    w_t = jnp.transpose(w, (3, 0, 1, 2)) * scale[:, None, None, None]
    w_t = jnp.pad(w_t, ((0, cout_p - cout), (0, 0), (0, 0), (0, cin_p - cin)))
    w2d = w_t.reshape(cout_p, 9 * cin_p).astype(jnp.bfloat16)

    shift = jnp.pad(shift, (0, cout_p - cout)).reshape(cout_p, 1)
    return w2d, shift.astype(jnp.float32)


def stacked_conv_layers_forward(x_nchw, params):
    """StackedConvLayers.forward (inference). NCHW in / NCHW out like PyTorch."""
    N, Cin, H, W = x_nchw.shape
    cin_p = _round_up(Cin, 16)

    # Channels-on-sublane / flattened-spatial-on-lane layout; bf16 operands.
    x = x_nchw.reshape(N, Cin, H * W)
    x = jnp.pad(x, ((0, 0), (0, cin_p - Cin), (0, 0))).astype(jnp.bfloat16)

    block_params = []
    cin = Cin
    for p in params:
        block_params.append(_prep_block_params(p, cin))
        cin = p["w"].shape[-1]

    out = stacked_conv_fused(x, block_params, H, W, jnp.float32)
    cout = cin
    return out[:, :cout, :].reshape(N, cout, H, W)


def make_stacked_conv_params(key, input_channels, output_channels, num_convs):
    """Deterministic parameter init for StackedConvLayers (num_convs blocks)."""
    params = []
    cin = input_channels
    for _ in range(num_convs):
        key, kw, kb, kg, kbeta, km, kv = jax.random.split(key, 7)
        w = jax.random.normal(kw, (3, 3, cin, output_channels),
                              jnp.float32) * 0.1
        bias = jax.random.normal(kb, (output_channels,), jnp.float32) * 0.1
        gamma = 1.0 + 0.1 * jax.random.normal(kg, (output_channels,),
                                              jnp.float32)
        beta = 0.1 * jax.random.normal(kbeta, (output_channels,), jnp.float32)
        running_mean = 0.1 * jax.random.normal(km, (output_channels,),
                                               jnp.float32)
        running_var = 1.0 + 0.1 * jax.random.uniform(kv, (output_channels,),
                                                     jnp.float32)
        params.append(dict(w=w, bias=bias, gamma=gamma, beta=beta,
                           running_mean=running_mean,
                           running_var=running_var))
        cin = output_channels
    return params


def _reference_forward(x_nchw, params, eps=1e-5):
    """Pure-JAX reference (lax conv, bf16 operands / f32 accumulate)."""
    x = jnp.transpose(x_nchw, (0, 2, 3, 1))  # NHWC
    for p in params:
        y = lax.conv_general_dilated(
            x.astype(jnp.bfloat16), p["w"].astype(jnp.bfloat16),
            window_strides=(1, 1), padding="SAME",
            dimension_numbers=("NHWC", "HWIO", "NHWC"),
            preferred_element_type=jnp.float32)
        y = y + p["bias"]
        y = (y - p["running_mean"]) / jnp.sqrt(p["running_var"] + eps)
        y = y * p["gamma"] + p["beta"]
        x = jnp.where(y >= 0, y, 0.01 * y)
    return jnp.transpose(x, (0, 3, 1, 2))


if __name__ == "__main__":
    # StackedConvLayers(input_feature_channels=4, output_feature_channels=8,
    #                   num_convs=2) -- Conv2d 3x3 s1 p1 + bias, BN2d, LeakyReLU.
    N, Cin, H, W = 2, 4, 16, 16
    Cout, num_convs = 8, 2

    key = jax.random.PRNGKey(0)
    key, kx = jax.random.split(key)
    x = jax.random.normal(kx, (N, Cin, H, W), jnp.float32)  # NCHW like PyTorch
    params = make_stacked_conv_params(key, Cin, Cout, num_convs)

    fwd = jax.jit(stacked_conv_layers_forward)
    out = jax.block_until_ready(fwd(x, params))
    assert out.shape == (N, Cout, H, W), out.shape
    assert out.dtype == jnp.float32, out.dtype

    ref = jax.block_until_ready(_reference_forward(x, params))
    max_err = float(jnp.max(jnp.abs(out - ref)))
    # Slightly looser than pure-bf16-conv tolerance: the BN scale is folded
    # into the weights before bf16 quantization (fold done in f32).
    assert jnp.allclose(out, ref, atol=3e-2, rtol=3e-2), max_err

    print("KERNEL_OK")
</pallas_src>

<mosaic_0001>
module attributes {stable_mosaic.version = 11 : i64} {
  func.func @_stacked_conv_kernel(%arg0: i32, %arg1: memref<1x16x256xbf16, #tpu.memory_space<vmem>>, %arg2: memref<16x144xbf16, #tpu.memory_space<vmem>>, %arg3: memref<16x1xf32, #tpu.memory_space<vmem>>, %arg4: memref<16x144xbf16, #tpu.memory_space<vmem>>, %arg5: memref<16x1xf32, #tpu.memory_space<vmem>>, %arg6: memref<1x16x256xf32, #tpu.memory_space<vmem>>) attributes {dimension_semantics = [#tpu.dimension_semantics<parallel>], iteration_bounds = array<i64: 2>, scalar_prefetch = 0 : i64, scratch_operands = 0 : i64, tpu.core_type = #tpu.core_type<tc>, window_params = [{transform_indices = @transform_0, window_bounds = array<i64: 1, 16, 256>}, {pipeline_mode = #tpu.pipeline_mode<synchronous>, transform_indices = @transform_1, window_bounds = array<i64: 16, 144>}, {pipeline_mode = #tpu.pipeline_mode<synchronous>, transform_indices = @transform_2, window_bounds = array<i64: 16, 1>}, {pipeline_mode = #tpu.pipeline_mode<synchronous>, transform_indices = @transform_3, window_bounds = array<i64: 16, 144>}, {pipeline_mode = #tpu.pipeline_mode<synchronous>, transform_indices = @transform_4, window_bounds = array<i64: 16, 1>}, {transform_indices = @transform_5, window_bounds = array<i64: 1, 16, 256>}]} {
    %0 = tpu.iota {dimensions = array<i32: 1>} : vector<1x256xi32>
    %c16_i32 = arith.constant 16 : i32
    %c0_i32 = arith.constant 0 : i32
    %1 = arith.cmpi eq, %c16_i32, %c0_i32 : i32
    %c1_i32 = arith.constant 1 : i32
    %2 = arith.select %1, %c1_i32, %c16_i32 : i32
    %3 = vector.broadcast %2 : i32 to vector<1x256xi32>
    %4 = arith.remsi %0, %3 : vector<1x256xi32>
    %c0_i32_0 = arith.constant 0 : i32
    %5 = vector.broadcast %c0_i32_0 : i32 to vector<1x256xi32>
    %6 = arith.cmpi ne, %4, %5 : vector<1x256xi32>
    %c0_i32_1 = arith.constant 0 : i32
    %7 = vector.broadcast %c0_i32_1 : i32 to vector<1x256xi32>
    %8 = arith.cmpi slt, %4, %7 : vector<1x256xi32>
    %c0_i32_2 = arith.constant 0 : i32
    %9 = arith.cmpi slt, %2, %c0_i32_2 : i32
    %10 = vector.broadcast %9 : i1 to vector<1x256xi1>
    %11 = vector.broadcast %10 : vector<1x256xi1> to vector<1x256xi1>
    %12 = arith.xori %8, %11 : vector<1x256xi1>
    %13 = arith.andi %12, %6 : vector<1x256xi1>
    %14 = vector.broadcast %2 : i32 to vector<1x256xi32>
    %15 = arith.addi %4, %14 : vector<1x256xi32>
    %16 = arith.select %13, %15, %4 : vector<1x256xi1>, vector<1x256xi32>
    %c1_i32_3 = arith.constant 1 : i32
    %17 = vector.broadcast %c1_i32_3 : i32 to vector<1x256xi32>
    %18 = arith.cmpi sge, %16, %17 : vector<1x256xi32>
    %c15_i32 = arith.constant 15 : i32
    %19 = vector.broadcast %c15_i32 : i32 to vector<1x256xi32>
    %20 = arith.cmpi slt, %16, %19 : vector<1x256xi32>
    %c0 = arith.constant 0 : index
    %c0_4 = arith.constant 0 : index
    %c0_5 = arith.constant 0 : index
    %21 = vector.load %arg1[%c0, %c0_4, %c0_5] : memref<1x16x256xbf16, #tpu.memory_space<vmem>>, vector<1x16x256xbf16>
    %22 = vector.shape_cast %21 : vector<1x16x256xbf16> to vector<16x256xbf16>
    %cst = arith.constant 0.000000e+00 : bf16
    %23 = vector.broadcast %cst : bf16 to vector<16x256xbf16>
    %cst_6 = arith.constant 0.000000e+00 : bf16
    %24 = vector.broadcast %cst_6 : bf16 to vector<16x1xbf16>
    %25 = vector.extract_strided_slice %22 {offsets = [0, 0], sizes = [16, 255], strides = [1, 1]} : vector<16x256xbf16> to vector<16x255xbf16>
    %26 = tpu.concatenate %24, %25 in 1 : vector<16x1xbf16>, vector<16x255xbf16> -> vector<16x256xbf16>
    %27 = vector.shape_cast %18 : vector<1x256xi1> to vector<1x256xi1>
    %28 = vector.broadcast %27 : vector<1x256xi1> to vector<16x256xi1>
    %29 = arith.select %28, %26, %23 : vector<16x256xi1>, vector<16x256xbf16>
    %cst_7 = arith.constant 0.000000e+00 : bf16
    %30 = vector.broadcast %cst_7 : bf16 to vector<16x1xbf16>
    %31 = vector.extract_strided_slice %22 {offsets = [0, 1], sizes = [16, 255], strides = [1, 1]} : vector<16x256xbf16> to vector<16x255xbf16>
    %32 = tpu.concatenate %31, %30 in 1 : vector<16x255xbf16>, vector<16x1xbf16> -> vector<16x256xbf16>
    %33 = vector.shape_cast %20 : vector<1x256xi1> to vector<1x256xi1>
    %34 = vector.broadcast %33 : vector<1x256xi1> to vector<16x256xi1>
    %35 = arith.select %34, %32, %23 : vector<16x256xi1>, vector<16x256xbf16>
    %cst_8 = arith.constant 0.000000e+00 : bf16
    %36 = vector.broadcast %cst_8 : bf16 to vector<16x16xbf16>
    %37 = vector.extract_strided_slice %29 {offsets = [0, 0], sizes = [16, 240], strides = [1, 1]} : vector<16x256xbf16> to vector<16x240xbf16>
    %38 = tpu.concatenate %36, %37 in 1 : vector<16x16xbf16>, vector<16x240xbf16> -> vector<16x256xbf16>
    %cst_9 = arith.constant 0.000000e+00 : bf16
    %39 = vector.broadcast %cst_9 : bf16 to vector<16x16xbf16>
    %40 = vector.extract_strided_slice %22 {offsets = [0, 0], sizes = [16, 240], strides = [1, 1]} : vector<16x256xbf16> to vector<16x240xbf16>
    %41 = tpu.concatenate %39, %40 in 1 : vector<16x16xbf16>, vector<16x240xbf16> -> vector<16x256xbf16>
    %cst_10 = arith.constant 0.000000e+00 : bf16
    %42 = vector.broadcast %cst_10 : bf16 to vector<16x16xbf16>
    %43 = vector.extract_strided_slice %35 {offsets = [0, 0], sizes = [16, 240], strides = [1, 1]} : vector<16x256xbf16> to vector<16x240xbf16>
    %44 = tpu.concatenate %42, %43 in 1 : vector<16x16xbf16>, vector<16x240xbf16> -> vector<16x256xbf16>
    %cst_11 = arith.constant 0.000000e+00 : bf16
    %45 = vector.broadcast %cst_11 : bf16 to vector<16x16xbf16>
    %46 = vector.extract_strided_slice %29 {offsets = [0, 16], sizes = [16, 240], strides = [1, 1]} : vector<16x256xbf16> to vector<16x240xbf16>
    %47 = tpu.concatenate %46, %45 in 1 : vector<16x240xbf16>, vector<16x16xbf16> -> vector<16x256xbf16>
    %cst_12 = arith.constant 0.000000e+00 : bf16
    %48 = vector.broadcast %cst_12 : bf16 to vector<16x16xbf16>
    %49 = vector.extract_strided_slice %22 {offsets = [0, 16], sizes = [16, 240], strides = [1, 1]} : vector<16x256xbf16> to vector<16x240xbf16>
    %50 = tpu.concatenate %49, %48 in 1 : vector<16x240xbf16>, vector<16x16xbf16> -> vector<16x256xbf16>
    %cst_13 = arith.constant 0.000000e+00 : bf16
    %51 = vector.broadcast %cst_13 : bf16 to vector<16x16xbf16>
    %52 = vector.extract_strided_slice %35 {offsets = [0, 16], sizes = [16, 240], strides = [1, 1]} : vector<16x256xbf16> to vector<16x240xbf16>
    %53 = tpu.concatenate %52, %51 in 1 : vector<16x240xbf16>, vector<16x16xbf16> -> vector<16x256xbf16>
    %54 = tpu.concatenate %38, %41, %44, %29, %22, %35, %47, %50, %53 in 0 : vector<16x256xbf16>, vector<16x256xbf16>, vector<16x256xbf16>, vector<16x256xbf16>, vector<16x256xbf16>, vector<16x256xbf16>, vector<16x256xbf16>, vector<16x256xbf16>, vector<16x256xbf16> -> vector<144x256xbf16>
    %c0_14 = arith.constant 0 : index
    %c0_15 = arith.constant 0 : index
    %55 = vector.load %arg2[%c0_14, %c0_15] : memref<16x144xbf16, #tpu.memory_space<vmem>>, vector<16x144xbf16>
    %cst_16 = arith.constant dense<0.000000e+00> : vector<16x256xf32>
    %56 = tpu.matmul %55, %54, %cst_16 {dimension_numbers = #tpu.dot_dimension_numbers<[1], [0], [0], [1], [0, 0, 1, 1], [], []>} : vector<16x144xbf16>, vector<144x256xbf16>, vector<16x256xf32> -> vector<16x256xf32>
    %c0_17 = arith.constant 0 : index
    %c0_18 = arith.constant 0 : index
    %57 = vector.load %arg3[%c0_17, %c0_18] : memref<16x1xf32, #tpu.memory_space<vmem>>, vector<16x1xf32>
    %58 = vector.broadcast %57 : vector<16x1xf32> to vector<16x256xf32>
    %59 = arith.addf %56, %58 : vector<16x256xf32>
    %cst_19 = arith.constant 0.00999999977 : f32
    %60 = vector.broadcast %cst_19 : f32 to vector<16x256xf32>
    %61 = arith.mulf %60, %59 : vector<16x256xf32>
    %62 = arith.maximumf %59, %61 : vector<16x256xf32>
    %63 = arith.truncf %62 : vector<16x256xf32> to vector<16x256xbf16>
    %cst_20 = arith.constant 0.000000e+00 : bf16
    %64 = vector.broadcast %cst_20 : bf16 to vector<16x256xbf16>
    %cst_21 = arith.constant 0.000000e+00 : bf16
    %65 = vector.broadcast %cst_21 : bf16 to vector<16x1xbf16>
    %66 = vector.extract_strided_slice %63 {offsets = [0, 0], sizes = [16, 255], strides = [1, 1]} : vector<16x256xbf16> to vector<16x255xbf16>
    %67 = tpu.concatenate %65, %66 in 1 : vector<16x1xbf16>, vector<16x255xbf16> -> vector<16x256xbf16>
    %68 = vector.shape_cast %18 : vector<1x256xi1> to vector<1x256xi1>
    %69 = vector.broadcast %68 : vector<1x256xi1> to vector<16x256xi1>
    %70 = arith.select %69, %67, %64 : vector<16x256xi1>, vector<16x256xbf16>
    %cst_22 = arith.constant 0.000000e+00 : bf16
    %71 = vector.broadcast %cst_22 : bf16 to vector<16x1xbf16>
    %72 = vector.extract_strided_slice %63 {offsets = [0, 1], sizes = [16, 255], strides = [1, 1]} : vector<16x256xbf16> to vector<16x255xbf16>
    %73 = tpu.concatenate %72, %71 in 1 : vector<16x255xbf16>, vector<16x1xbf16> -> vector<16x256xbf16>
    %74 = vector.shape_cast %20 : vector<1x256xi1> to vector<1x256xi1>
    %75 = vector.broadcast %74 : vector<1x256xi1> to vector<16x256xi1>
    %76 = arith.select %75, %73, %64 : vector<16x256xi1>, vector<16x256xbf16>
    %cst_23 = arith.constant 0.000000e+00 : bf16
    %77 = vector.broadcast %cst_23 : bf16 to vector<16x16xbf16>
    %78 = vector.extract_strided_slice %70 {offsets = [0, 0], sizes = [16, 240], strides = [1, 1]} : vector<16x256xbf16> to vector<16x240xbf16>
    %79 = tpu.concatenate %77, %78 in 1 : vector<16x16xbf16>, vector<16x240xbf16> -> vector<16x256xbf16>
    %cst_24 = arith.constant 0.000000e+00 : bf16
    %80 = vector.broadcast %cst_24 : bf16 to vector<16x16xbf16>
    %81 = vector.extract_strided_slice %63 {offsets = [0, 0], sizes = [16, 240], strides = [1, 1]} : vector<16x256xbf16> to vector<16x240xbf16>
    %82 = tpu.concatenate %80, %81 in 1 : vector<16x16xbf16>, vector<16x240xbf16> -> vector<16x256xbf16>
    %cst_25 = arith.constant 0.000000e+00 : bf16
    %83 = vector.broadcast %cst_25 : bf16 to vector<16x16xbf16>
    %84 = vector.extract_strided_slice %76 {offsets = [0, 0], sizes = [16, 240], strides = [1, 1]} : vector<16x256xbf16> to vector<16x240xbf16>
    %85 = tpu.concatenate %83, %84 in 1 : vector<16x16xbf16>, vector<16x240xbf16> -> vector<16x256xbf16>
    %cst_26 = arith.constant 0.000000e+00 : bf16
    %86 = vector.broadcast %cst_26 : bf16 to vector<16x16xbf16>
    %87 = vector.extract_strided_slice %70 {offsets = [0, 16], sizes = [16, 240], strides = [1, 1]} : vector<16x256xbf16> to vector<16x240xbf16>
    %88 = tpu.concatenate %87, %86 in 1 : vector<16x240xbf16>, vector<16x16xbf16> -> vector<16x256xbf16>
    %cst_27 = arith.constant 0.000000e+00 : bf16
    %89 = vector.broadcast %cst_27 : bf16 to vector<16x16xbf16>
    %90 = vector.extract_strided_slice %63 {offsets = [0, 16], sizes = [16, 240], strides = [1, 1]} : vector<16x256xbf16> to vector<16x240xbf16>
    %91 = tpu.concatenate %90, %89 in 1 : vector<16x240xbf16>, vector<16x16xbf16> -> vector<16x256xbf16>
    %cst_28 = arith.constant 0.000000e+00 : bf16
    %92 = vector.broadcast %cst_28 : bf16 to vector<16x16xbf16>
    %93 = vector.extract_strided_slice %76 {offsets = [0, 16], sizes = [16, 240], strides = [1, 1]} : vector<16x256xbf16> to vector<16x240xbf16>
    %94 = tpu.concatenate %93, %92 in 1 : vector<16x240xbf16>, vector<16x16xbf16> -> vector<16x256xbf16>
    %95 = tpu.concatenate %79, %82, %85, %70, %63, %76, %88, %91, %94 in 0 : vector<16x256xbf16>, vector<16x256xbf16>, vector<16x256xbf16>, vector<16x256xbf16>, vector<16x256xbf16>, vector<16x256xbf16>, vector<16x256xbf16>, vector<16x256xbf16>, vector<16x256xbf16> -> vector<144x256xbf16>
    %c0_29 = arith.constant 0 : index
    %c0_30 = arith.constant 0 : index
    %96 = vector.load %arg4[%c0_29, %c0_30] : memref<16x144xbf16, #tpu.memory_space<vmem>>, vector<16x144xbf16>
    %cst_31 = arith.constant dense<0.000000e+00> : vector<16x256xf32>
    %97 = tpu.matmul %96, %95, %cst_31 {dimension_numbers = #tpu.dot_dimension_numbers<[1], [0], [0], [1], [0, 0, 1, 1], [], []>} : vector<16x144xbf16>, vector<144x256xbf16>, vector<16x256xf32> -> vector<16x256xf32>
    %c0_32 = arith.constant 0 : index
    %c0_33 = arith.constant 0 : index
    %98 = vector.load %arg5[%c0_32, %c0_33] : memref<16x1xf32, #tpu.memory_space<vmem>>, vector<16x1xf32>
    %99 = vector.broadcast %98 : vector<16x1xf32> to vector<16x256xf32>
    %100 = arith.addf %97, %99 : vector<16x256xf32>
    %cst_34 = arith.constant 0.00999999977 : f32
    %101 = vector.broadcast %cst_34 : f32 to vector<16x256xf32>
    %102 = arith.mulf %101, %100 : vector<16x256xf32>
    %103 = arith.maximumf %100, %102 : vector<16x256xf32>
    %104 = vector.shape_cast %103 : vector<16x256xf32> to vector<1x16x256xf32>
    %c0_35 = arith.constant 0 : index
    %c0_36 = arith.constant 0 : index
    %c0_37 = arith.constant 0 : index
    %105 = vector.load %arg6[%c0_35, %c0_36, %c0_37] : memref<1x16x256xf32, #tpu.memory_space<vmem>>, vector<1x16x256xf32>
    tpu.vector_store %arg6[%c0_35, %c0_36, %c0_37], %104 {strides = array<i32>} : memref<1x16x256xf32, #tpu.memory_space<vmem>>, vector<1x16x256xf32>,
    return
  }
  func.func @transform_0(%arg0: i32) -> (i32, i32, i32) {
    %c0_i32 = arith.constant 0 : i32
    %c0_i32_0 = arith.constant 0 : i32
    %c0_i32_1 = arith.constant 0 : i32
    return %arg0, %c0_i32, %c0_i32_0 : i32, i32, i32
  }
  func.func @transform_1(%arg0: i32) -> (i32, i32) {
    %c0_i32 = arith.constant 0 : i32
    %c0_i32_0 = arith.constant 0 : i32
    %c0_i32_1 = arith.constant 0 : i32
    return %c0_i32, %c0_i32_0 : i32, i32
  }
  func.func @transform_2(%arg0: i32) -> (i32, i32) {
    %c0_i32 = arith.constant 0 : i32
    %c0_i32_0 = arith.constant 0 : i32
    %c0_i32_1 = arith.constant 0 : i32
    return %c0_i32, %c0_i32_0 : i32, i32
  }
  func.func @transform_3(%arg0: i32) -> (i32, i32) {
    %c0_i32 = arith.constant 0 : i32
    %c0_i32_0 = arith.constant 0 : i32
    %c0_i32_1 = arith.constant 0 : i32
    return %c0_i32, %c0_i32_0 : i32, i32
  }
  func.func @transform_4(%arg0: i32) -> (i32, i32) {
    %c0_i32 = arith.constant 0 : i32
    %c0_i32_0 = arith.constant 0 : i32
    %c0_i32_1 = arith.constant 0 : i32
    return %c0_i32, %c0_i32_0 : i32, i32
  }
  func.func @transform_5(%arg0: i32) -> (i32, i32, i32) {
    %c0_i32 = arith.constant 0 : i32
    %c0_i32_0 = arith.constant 0 : i32
    %c0_i32_1 = arith.constant 0 : i32
    return %arg0, %c0_i32, %c0_i32_0 : i32, i32, i32
  }
}

</mosaic_0001>

<bundles_post_ra>
// kernel: stacked_conv_layers_forward.1
= control target key start
LH: loop header
LB: loop body
LE: loop exit
PB: predicated region body
PF: predicated region fallthrough
CT: control target
= control target key end

     0   :  { %s799_s18 = smov 0   ;;  %s971_s0 = inlined_call_operand.vmem [shape: bf16[2,16,256], index: 0, kind: input, shape index: {}]   ;;  %s972_s1 = inlined_call_operand.vmem [shape: bf16[16,144], index: 1, kind: input, shape index: {}]   ;;  %s973_s2 = inlined_call_operand.vmem [shape: f32[16,1], index: 2, kind: input, shape index: {}]   ;;  %s974_s3 = inlined_call_operand.vmem [shape: bf16[16,144], index: 3, kind: input, shape index: {}]   ;;  %s975_s4 = inlined_call_operand.vmem [shape: f32[16,1], index: 4, kind: input, shape index: {}]   ;;  %s976_s5 = inlined_call_operand.vmem [shape: f32[2,16,256], index: 5, kind: output, shape index: {}]  }
   0x1 LB: > { %s689_s19 = sadd.s32 4294967295, %s762_s18   ;;  %p693_p0 = scmp.ge.s32.totalorder %s762_s18, 1  ;;  %s762_s18 = sphi %s799_s18, %s15_s18  }
   0x2   : > { %p187_p1 = scmp.lt.s32.totalorder %s762_s18, 3 }
   0x4   : > { %p188_p2 = pnand %p693_p0, %p187_p1 }
   0x5   : > { %p215_p3 = scmp.lt.s32.totalorder (!%p188_p2), %s689_s19, 1  ;;  %v764_v0 = vmov (!%p188_p2), 0   ;;  %s765_s24 = smov (!%p188_p2), 1   ;;  %v228_v3 = vlaneseq (!%p188_p2)  ;;  %vm273_vm6 = vcmask (!%p188_p2), 7168   ;;  %vm303_vm8 = vcmask (!%p188_p2), 1039360   ;;  %v394_v30 = vld [vmem:[%s973_s2] sm:$0xff] (!%p188_p2) }
   0x6   : > { %191 = sbr.rel (%p188_p2) target bundleno = 1004 (0x3ec), region = 40  ;;  %745 = vset.pattern.permute.xlu0 (!%p188_p2), %v764_v0  ;;  %746 = vset.pattern.permute.xlu1 (!%p188_p2), %v764_v0  ;;  %s766_s25 = smov (!%p188_p2), 127   ;;  %v752_v29 = vld [vmem:[%s972_s1 + $0x4] ss:$8 sps:$4 sm:$0xff] (!%p188_p2)   ;;  %vm334_vm12 = vcmask (!%p188_p2), 130048   ;;  %vm365_vm14 = vcmask (!%p188_p2), 916480  }
   0x7   : > { %v229_v4 = vand.u32 (!%p188_p2), 127, %v228_v3  ;;  %v288_v8 = vshrl.u32 (!%p188_p2), %v228_v3, 7  ;;  %s767_s26 = smov (!%p188_p2), 16   ;;  %s768_s27 = smov (!%p188_p2), 112   ;;  %713 = vmatprep.mubr.msk.bf16.mxu0 (!%p188_p2), %vm334_vm12, %v752_v29  ;;  %v395_v31 = vld [vmem:[%s973_s2 + $0x8] sm:$0xff] (!%p188_p2)  ;;  %vm876_vm13 = vmneg (!%p188_p2), %vm334_vm12 }
   0x8   : > { %v750_v51 = vld [vmem:[%s972_s1] ss:$8 sps:$4 sm:$0xff] (!%p188_p2)  }
   0x9   : > { %v230_v5 = vadd.s32 (!%p188_p2), 128, %v229_v4  ;;  %v235_v6 = vand.u32 (!%p188_p2), 15, %v229_v4  ;;  %v289_v9 = vsub.s32 (!%p188_p2), 0, %v288_v8  ;;  %v293_v12 = vsub.s32 (!%p188_p2), 4, %v288_v8 }
   0xb   : > { %v242_v7 = vand.u32 (!%p188_p2), 15, %v230_v5  ;;  %vm255_vm0 = vcmp.ge.s32.totalorder (!%p188_p2), %v235_v6, 1  ;;  %vm257_vm3 = vcmp.lt.s32.totalorder (!%p188_p2), %v235_v6, 15 }
   0xd   : > { %s980_s19 = smov (!%p215_p3, %s689_s19), 1  ;;  %vm256_vm1 = vcmp.ge.s32.totalorder %v242_v7, 1  ;;  %vm258_vm4 = vcmp.lt.s32.totalorder %v242_v7, 15 }
   0xe   : > { %s730_s20 = sshll.u32 %s980_s19, 4  ;;  %vm285_vm2 = vmpackc.low %vm256_vm1, %vm255_vm0  ;;  %s731_s21 = sshll.u32 %s980_s19, 5 }
   0xf   : > { %s219_s23 = scalar_lea.vmem %s971_s0, %s730_s20  ;;  %v286_v10 = vsel %vm285_vm2, 65537, %v764_v0  ;;  %vm314_vm5 = vmpackc.low %vm258_vm4, %vm257_vm3 }
  0x10   : > { %v813_v1 = vld [vmem:[%s219_s23] ss:$8 sps:$4 sm:$0xff]   ;;  %v819_v2 = vld [vmem:[%s219_s23 + $0x4] ss:$8 sps:$4 sm:$0xff]   ;;  %v825_v11 = vrot.slane %v286_v10, %v289_v9  ;;  %v315_v13 = vsel %vm314_vm5, 65537, %v764_v0  ;;  %v827_v14 = vrot.slane %v286_v10, %v293_v12 }
  0x11   : > { %269 = vrot.lane.b32.xlu0 %v813_v1, %s765_s24  ;;  %299 = vrot.lane.b32.xlu1 %v813_v1, %s766_s25  ;;  %v831_v18 = vrot.slane %v315_v13, %v289_v9  ;;  %v839_v24 = vrot.slane %v315_v13, %v293_v12 }
  0x12   : > { %vm295_vm7 = vcmp.ne.s16.totalorder %v825_v11, 0  ;;  %vm296_vm9 = vcmp.ne.s16.totalorder %v827_v14, 0 }
  0x13   : > { %vm324_vm10 = vcmp.ne.s16.totalorder %v831_v18, 0  ;;  %vm325_vm11 = vcmp.ne.s16.totalorder %v839_v24, 0  ;;  %v555_v18 = vld [vmem:[%s975_s4] sm:$0xff] }
  0x15   : > { %271 = vrot.lane.b32.xlu0 %v819_v2, %s765_s24  ;;  %301 = vrot.lane.b32.xlu1 %v819_v2, %s766_s25 }
  0x83   : > { %v270_v15 = vpop.permute.xlu0 %269  ;;  %v300_v16 = vpop.permute.xlu1 %299 }
  0x84   : > { %v279_v17 = vsel %vm273_vm6, 0, %v270_v15 }
  0x85   : > { %v297_v19 = vsel %vm295_vm7, %v279_v17, 0 }
  0x86   : > { %330 = vrot.lane.b32.xlu0 %v297_v19, %s767_s26 }
  0x87   : > { %v272_v20 = vpop.permute.xlu0 %271  ;;  %v302_v21 = vpop.permute.xlu1 %301 }
  0x88   : > { %v274_v22 = vsel %vm273_vm6, %v270_v15, %v272_v20  ;;  %v304_v23 = vsel %vm303_vm8, %v300_v16, %v302_v21  ;;  %v308_v27 = vsel %vm303_vm8, %v302_v21, 0 }
  0x89   : > { %v298_v25 = vsel %vm296_vm9, %v274_v22, 0  ;;  %v326_v26 = vsel %vm324_vm10, %v304_v23, 0  ;;  %v327_v28 = vsel %vm325_vm11, %v308_v27, 0  ;;  %v755_v23 = vld [vmem:[%s974_s3 + $0x4] ss:$8 sps:$4 sm:$0xff]  }
  0x8a   : > { %341 = vrot.lane.b32.xlu0 %v813_v1, %s767_s26  ;;  %332 = vrot.lane.b32.xlu1 %v298_v25, %s767_s26 }
  0x8b   : > { %727 = vmatprep.mubr.msk.bf16.mxu1 %vm334_vm12, %v755_v23 }
  0x8e   : > { %352 = vrot.lane.b32.xlu0 %v326_v26, %s767_s26  ;;  %343 = vrot.lane.b32.xlu1 %v819_v2, %s767_s26 }
  0x92   : > { %361 = vrot.lane.b32.xlu0 %v297_v19, %s768_s27  ;;  %354 = vrot.lane.b32.xlu1 %v327_v28, %s767_s26 }
  0x96   : > { %372 = vrot.lane.b32.xlu0 %v813_v1, %s768_s27  ;;  %363 = vrot.lane.b32.xlu1 %v298_v25, %s768_s27 }
  0x9a   : > { %381 = vrot.lane.b32.xlu0 %v326_v26, %s768_s27  ;;  %374 = vrot.lane.b32.xlu1 %v819_v2, %s768_s27 }
  0x9e   : > { %383 = vrot.lane.b32.xlu1 %v327_v28, %s768_s27  ;;  %398 = vperm.xlu0 %745, %v394_v30  }
  0xa2   : > { %403 = vperm.xlu1 %746, %v395_v31  }
  0xf8   : > { %v331_v32 = vpop.permute.xlu0 %330 }
  0xfc   : > { %v333_v33 = vpop.permute.xlu1 %332  ;;  %v342_v36 = vpop.permute.xlu0 %341 }
  0xfd   : > { %v335_v35 = vsel %vm334_vm12, %v331_v32, %v333_v33 }
  0xfe   : > { %418 = vmatprep.subr.bf16.mxu0 %v335_v35 }
  0xff   : > { %703 = vmatpush1.bf16.msk.msra.mxu0 %vm876_vm13, %v331_v32 }
 0x100   : > { %v344_v37 = vpop.permute.xlu1 %343  ;;  %v353_v39 = vpop.permute.xlu0 %352 }
 0x101   : > { %v345_v38 = vsel %vm334_vm12, %v342_v36, %v344_v37 }
 0x102   : > { %420 = vmatprep.subr.bf16.mxu0 %v345_v38 }
 0x103   : > { %705 = vmatpush1.bf16.msk.msra.mxu0 %vm876_vm13, %v342_v36 }
 0x104   : > { %v355_v40 = vpop.permute.xlu1 %354  ;;  %v362_v43 = vpop.permute.xlu0 %361 }
 0x105   : > { %v356_v41 = vsel %vm334_vm12, %v353_v39, %v355_v40 }
 0x106   : > { %422 = vmatprep.subr.bf16.mxu0 %v356_v41  ;;  %v753_v41 = vld [vmem:[%s974_s3] ss:$8 sps:$4 sm:$0xff]  }
 0x107   : > { %707 = vmatpush1.bf16.msk.msra.mxu0 %vm876_vm13, %v353_v39 }
 0x108   : > { %708 = vmatprep.subr.msk.bf16.mxu0 %vm296_vm9, %v274_v22  ;;  %v364_v42 = vpop.permute.xlu1 %363  ;;  %v373_v46 = vpop.permute.xlu0 %372  ;;  %v556_v22 = vld [vmem:[%s975_s4 + $0x8] sm:$0xff] }
 0x109   : > { %v366_v45 = vsel %vm365_vm14, %v362_v43, %v364_v42 }
 0x10b   : > { %425 = vmatpush1.bf16.msra.mxu0 %v297_v19 }
 0x10c   : > { %426 = vmatprep.subr.bf16.mxu0 %v819_v2  ;;  %v375_v44 = vpop.permute.xlu1 %374  ;;  %v382_v49 = vpop.permute.xlu0 %381 }
 0x10d   : > { %v376_v47 = vsel %vm365_vm14, %v373_v46, %v375_v44 }
 0x10f   : > { %427 = vmatpush1.bf16.msra.mxu0 %v813_v1 }
 0x110   : > { %709 = vmatprep.subr.msk.bf16.mxu0 %vm325_vm11, %v308_v27  ;;  %v384_v48 = vpop.permute.xlu1 %383 }
 0x111   : > { %v385_v50 = vsel %vm365_vm14, %v382_v49, %v384_v48 }
 0x113   : > { %429 = vmatpush1.bf16.msra.mxu0 %v326_v26 }
 0x114   : > { %710 = vmatprep.subr.msk.bf16.mxu0 %vm365_vm14, %v364_v42 }
 0x117   : > { %431 = vmatpush1.bf16.msra.mxu0 %v366_v45 }
 0x118   : > { %711 = vmatprep.subr.msk.bf16.mxu0 %vm365_vm14, %v375_v44 }
 0x11b   : > { %433 = vmatpush1.bf16.msra.mxu0 %v376_v47 }
 0x11c   : > { %712 = vmatprep.subr.msk.bf16.mxu0 %vm365_vm14, %v384_v48 }
 0x11d   : > { %v399_v52 = vpop.permute.xlu0 %398 }
 0x11f   : > { %435 = vmatpush1.bf16.msra.mxu0 %v385_v50 }
 0x121   : > { %v404_v54 = vpop.permute.xlu1 %403 }
 0x122   : > { %451 = vmatmul.mubr.bf16.vlgmr.msra.gmra.mrb[0].mxu0 %v750_v51 }
 0x1f5   : > { %v452_v53 = vpop.f32.mrb[0].mxu0 }
 0x1f6   : > { %v453_v55 = vadd.f32 %v452_v53, %v399_v52  ;;  %v454_v56 = vpop.f32.mrb[1].mxu0 }
 0x1f7   : > { %v455_v57 = vadd.f32 %v454_v56, %v399_v52  ;;  %v456_v58 = vpop.f32.mrb[2].mxu0 }
 0x1f8   : > { %v461_v59 = vmul.f32 0.01, %v453_v55  ;;  %v457_v60 = vadd.f32 %v456_v58, %v404_v54  ;;  %v458_v61 = vpop.f32.mrb[3].mxu0 }
 0x1f9   : > { %v462_v62 = vmul.f32 0.01, %v455_v57  ;;  %v459_v63 = vadd.f32 %v458_v61, %v404_v54 }
 0x1fa   : > { %v463_v0 = vmul.f32 0.01, %v457_v60  ;;  %v465_v2 = vmax.f32 %v453_v55, %v461_v59 }
 0x1fb   : > { %v464_v1 = vmul.f32 0.01, %v459_v63  ;;  %v466_v4 = vmax.f32 %v455_v57, %v462_v62 }
 0x1fc   : > { %v467_v3 = vmax.f32 %v457_v60, %v463_v0 }
 0x1fd   : > { %v468_v5 = vmax.f32 %v459_v63, %v464_v1 }
 0x1fe   : > { %v469_v6 = vpack.c.bf16 %v467_v3, %v465_v2 }
 0x1ff   : > { %v470_v7 = vpack.c.bf16 %v468_v5, %v466_v4 }
 0x200   : > { %473 = vrot.lane.b32.xlu1 %v469_v6, %s765_s24 }
 0x201   : > { %475 = vrot.lane.b32.xlu0 %v470_v7, %s765_s24  ;;  %s224_s24 = scalar_lea.vmem %s976_s5, %s731_s21 }
 0x204   : > { %484 = vrot.lane.b32.xlu1 %v469_v6, %s766_s25 }
 0x205   : > { %486 = vrot.lane.b32.xlu0 %v470_v7, %s766_s25 }
 0x272   : > { %v474_v8 = vpop.permute.xlu1 %473 }
 0x273   : > { %v480_v9 = vsel %vm273_vm6, 0, %v474_v8  ;;  %v476_v10 = vpop.permute.xlu0 %475 }
 0x274   : > { %v477_v12 = vsel %vm273_vm6, %v474_v8, %v476_v10  ;;  %v482_v13 = vsel %vm295_vm7, %v480_v9, 0 }
 0x275   : > { %497 = vrot.lane.b32.xlu1 %v482_v13, %s767_s26  ;;  %v483_v15 = vsel %vm296_vm9, %v477_v12, 0 }
 0x276   : > { %499 = vrot.lane.b32.xlu0 %v483_v15, %s767_s26  ;;  %v485_v16 = vpop.permute.xlu1 %484 }
 0x277   : > { %v487_v17 = vpop.permute.xlu0 %486 }
 0x278   : > { %v488_v19 = vsel %vm303_vm8, %v485_v16, %v487_v17  ;;  %v491_v20 = vsel %vm303_vm8, %v487_v17, 0 }
 0x279   : > { %506 = vrot.lane.b32.xlu1 %v469_v6, %s767_s26  ;;  %v493_v11 = vsel %vm324_vm10, %v488_v19, 0  ;;  %v494_v21 = vsel %vm325_vm11, %v491_v20, 0 }
 0x27a   : > { %508 = vrot.lane.b32.xlu0 %v470_v7, %s767_s26 }
 0x27d   : > { %517 = vrot.lane.b32.xlu1 %v493_v11, %s767_s26 }
 0x27e   : > { %519 = vrot.lane.b32.xlu0 %v494_v21, %s767_s26 }
 0x281   : > { %526 = vrot.lane.b32.xlu1 %v482_v13, %s768_s27 }
 0x282   : > { %528 = vrot.lane.b32.xlu0 %v483_v15, %s768_s27 }
 0x285   : > { %535 = vrot.lane.b32.xlu1 %v469_v6, %s768_s27 }
 0x286   : > { %537 = vrot.lane.b32.xlu0 %v470_v7, %s768_s27 }
 0x289   : > { %544 = vrot.lane.b32.xlu1 %v493_v11, %s768_s27 }
 0x28a   : > { %546 = vrot.lane.b32.xlu0 %v494_v21, %s768_s27 }
 0x28d   : > { %559 = vperm.xlu1 %746, %v555_v18  }
 0x28e   : > { %564 = vperm.xlu0 %745, %v556_v22  }
 0x2e7   : > { %v498_v25 = vpop.permute.xlu1 %497 }
 0x2e8   : > { %v500_v26 = vpop.permute.xlu0 %499 }
 0x2e9   : > { %v501_v27 = vsel %vm334_vm12, %v498_v25, %v500_v26 }
 0x2ea   : > { %579 = vmatprep.subr.bf16.mxu1 %v501_v27 }
 0x2eb   : > { %717 = vmatpush1.bf16.msk.msra.mxu1 %vm876_vm13, %v498_v25  ;;  %v507_v28 = vpop.permute.xlu1 %506 }
 0x2ec   : > { %v509_v29 = vpop.permute.xlu0 %508 }
 0x2ed   : > { %v510_v30 = vsel %vm334_vm12, %v507_v28, %v509_v29 }
 0x2ee   : > { %581 = vmatprep.subr.bf16.mxu1 %v510_v30 }
 0x2ef   : > { %719 = vmatpush1.bf16.msk.msra.mxu1 %vm876_vm13, %v507_v28  ;;  %v518_v31 = vpop.permute.xlu1 %517 }
 0x2f0   : > { %v520_v32 = vpop.permute.xlu0 %519 }
 0x2f1   : > { %v521_v33 = vsel %vm334_vm12, %v518_v31, %v520_v32 }
 0x2f2   : > { %583 = vmatprep.subr.bf16.mxu1 %v521_v33 }
 0x2f3   : > { %721 = vmatpush1.bf16.msk.msra.mxu1 %vm876_vm13, %v518_v31  ;;  %v527_v35 = vpop.permute.xlu1 %526 }
 0x2f4   : > { %722 = vmatprep.subr.msk.bf16.mxu1 %vm296_vm9, %v477_v12  ;;  %v529_v36 = vpop.permute.xlu0 %528 }
 0x2f5   : > { %v530_v34 = vsel %vm365_vm14, %v527_v35, %v529_v36 }
 0x2f7   : > { %586 = vmatpush1.bf16.msra.mxu1 %v482_v13  ;;  %v536_v37 = vpop.permute.xlu1 %535 }
 0x2f8   : > { %587 = vmatprep.subr.bf16.mxu1 %v470_v7  ;;  %v538_v38 = vpop.permute.xlu0 %537 }
 0x2f9   : > { %v539_v14 = vsel %vm365_vm14, %v536_v37, %v538_v38 }
 0x2fb   : > { %588 = vmatpush1.bf16.msra.mxu1 %v469_v6  ;;  %v545_v39 = vpop.permute.xlu1 %544 }
 0x2fc   : > { %723 = vmatprep.subr.msk.bf16.mxu1 %vm325_vm11, %v491_v20  ;;  %v547_v40 = vpop.permute.xlu0 %546 }
 0x2fd   : > { %v548_v24 = vsel %vm365_vm14, %v545_v39, %v547_v40 }
 0x2ff   : > { %590 = vmatpush1.bf16.msra.mxu1 %v493_v11 }
 0x300   : > { %724 = vmatprep.subr.msk.bf16.mxu1 %vm365_vm14, %v529_v36 }
 0x303   : > { %592 = vmatpush1.bf16.msra.mxu1 %v530_v34 }
 0x304   : > { %725 = vmatprep.subr.msk.bf16.mxu1 %vm365_vm14, %v538_v38 }
 0x307   : > { %594 = vmatpush1.bf16.msra.mxu1 %v539_v14 }
 0x308   : > { %726 = vmatprep.subr.msk.bf16.mxu1 %vm365_vm14, %v547_v40 }
 0x30b   : > { %596 = vmatpush1.bf16.msra.mxu1 %v548_v24 }
 0x30c   : > { %v560_v42 = vpop.permute.xlu1 %559 }
 0x30d   : > { %v565_v46 = vpop.permute.xlu0 %564 }
 0x30e   : > { %612 = vmatmul.mubr.bf16.vlgmr.msra.gmra.mrb[0].mxu1 %v753_v41 }
 0x3e1   : > { %v613_v43 = vpop.f32.mrb[0].mxu1 }
 0x3e2   : > { %v614_v44 = vadd.f32 %v613_v43, %v560_v42  ;;  %v615_v45 = vpop.f32.mrb[1].mxu1 }
 0x3e3   : > { %v616_v47 = vadd.f32 %v615_v45, %v560_v42  ;;  %v617_v48 = vpop.f32.mrb[2].mxu1 }
 0x3e4   : > { %v622_v49 = vmul.f32 0.01, %v614_v44  ;;  %v618_v50 = vadd.f32 %v617_v48, %v565_v46  ;;  %v619_v51 = vpop.f32.mrb[3].mxu1 }
 0x3e5   : > { %v623_v52 = vmul.f32 0.01, %v616_v47  ;;  %v620_v53 = vadd.f32 %v619_v51, %v565_v46 }
 0x3e6   : > { %v626_v54 = vmax.f32 %v614_v44, %v622_v49  ;;  %v624_v55 = vmul.f32 0.01, %v618_v50 }
 0x3e7   : > { %v627_v56 = vmax.f32 %v616_v47, %v623_v52  ;;  %v625_v57 = vmul.f32 0.01, %v620_v53 }
 0x3e8   : > { %630 = vst [vmem:[%s224_s24] sm:$0xff] %v626_v54  ;;  %v628_v58 = vmax.f32 %v618_v50, %v624_v55 }
 0x3e9   : > { %631 = vst [vmem:[%s224_s24 + $0x8] sm:$0xff] %v627_v56  ;;  %v629_v59 = vmax.f32 %v620_v53, %v625_v57 }
 0x3ea   : > { %632 = vst [vmem:[%s224_s24 + $0x10] sm:$0xff] %v628_v58 }
 0x3eb   : > { %633 = vst [vmem:[%s224_s24 + $0x18] sm:$0xff] %v629_v59 }
 0x3ec PF: > { %s15_s18 = sadd.s32 1, %s762_s18  }
 0x3ed   : > { %p12_p4 = scmp.ge.s32.totalorder %s15_s18, 4  }
 0x3ef   :  { %14 = sbr.rel (!%p12_p4) target bundleno = 1 (0x1), region = 70 }

</bundles_post_ra>
